<compile_context>
chip_gen: v5e
topology: v5e:2x2
jax: 0.10.0
libtpu: 0.0.40
codegen_flags: <defaults>
</compile_context>

<pallas_src>
import functools

import jax
import jax.numpy as jnp
from jax.experimental import pallas as pl
from jax.experimental.pallas import tpu as pltpu


def _round_up(n: int, m: int) -> int:
    return ((n + m - 1) // m) * m


def _vmem_budget_bytes() -> int:
    """~80% of physical VMEM (v5e/v6e: 128 MiB, v7x: 64 MiB)."""
    try:
        cap = int(pltpu.get_tpu_info().vmem_capacity_bytes)
    except Exception:
        cap = 64 * 2**20  # conservative fallback (v7x physical)
    return int(cap * 0.8)


def _autoencoder_kernel(x_ref, w1_ref, b1_ref, w2_ref, b2_ref, o_ref):
    # x_ref:  (tb, input_size)      in x's storage dtype (typically f32)
    # w1_ref: (input_size, hidden)  stream dtype (bf16)   b1_ref: (1, hidden)     f32
    # w2_ref: (hidden, input_size)  stream dtype (bf16)   b2_ref: (1, input_size) f32
    # o_ref:  (tb, input_size)      output storage dtype (bf16 by default)

    # In-kernel cast to the MXU stream dtype (no separate wrapper HBM pass).
    x = x_ref[...].astype(w1_ref.dtype)

    # Encoder linear + ReLU: bf16 MXU matmul, f32 accumulate / f32 epilogue.
    h = jnp.dot(x, w1_ref[...], preferred_element_type=jnp.float32) + b1_ref[...]
    h = jnp.maximum(h, 0.0)

    # Decoder linear: back to the stream dtype for the second bf16 MXU pass.
    y = (
        jnp.dot(h.astype(w2_ref.dtype), w2_ref[...],
                preferred_element_type=jnp.float32)
        + b2_ref[...]
    )

    # sigmoid(y) = 0.5 * tanh(y / 2) + 0.5  -> single EUP transcendental.
    o_ref[...] = (0.5 * jnp.tanh(0.5 * y) + 0.5).astype(o_ref.dtype)


@functools.partial(jax.jit, static_argnames=("tb", "out_dtype"))
def autoencoder_forward(x, w1, b1, w2, b2, *, tb: int = 1024, out_dtype=None):
    """x: (B, input_size); w1: (input_size, hidden); w2: (hidden, input_size).

    Weights are stored pre-transposed to [in, out] (and ideally pre-cast to
    bf16, see init_params) so the kernel runs plain row-major bf16 MXU
    matmuls. The output dtype defaults to the weight/stream dtype.
    """
    B, input_size = x.shape
    hidden = w1.shape[1]
    assert w1.shape == (input_size, hidden)
    assert w2.shape == (hidden, input_size)

    stream_dtype = w1.dtype
    if out_dtype is None:
        out_dtype = stream_dtype

    # Biases stay f32 for the epilogue (tiny, grid-invariant blocks).
    b1_2d = b1.reshape(1, hidden).astype(jnp.float32)
    b2_2d = b2.reshape(1, input_size).astype(jnp.float32)
    # No-op when the caller already stores bf16 weights (init_params does).
    w2_in = w2 if w2.dtype == stream_dtype else w2.astype(stream_dtype)

    # ---- batch tile:
    #   * multiple of 16 (bf16 sublane packing; also valid for f32 blocks),
    #   * no larger than the (rounded-up) batch,
    #   * >=2 grid steps whenever B allows it -> v7x 2-TC sharding + pipelining.
    tb = max(16, min(_round_up(tb, 16), _round_up(B, 16)))
    if B > 16:
        tb = min(tb, _round_up(pl.cdiv(B, 2), 16))

    # ---- VMEM estimate (double-buffered tiles & weights) + auto-shrink.
    def _vmem_needed(t: int) -> int:
        return (
            2 * t * input_size * jnp.dtype(x.dtype).itemsize        # x tiles
            + 2 * t * input_size * jnp.dtype(out_dtype).itemsize    # out tiles
            + 2 * input_size * hidden * jnp.dtype(stream_dtype).itemsize   # W1
            + 2 * hidden * input_size * jnp.dtype(stream_dtype).itemsize   # W2
            + 2 * (hidden + input_size) * 4                          # biases
            + 2 * t * max(hidden, input_size) * 4                    # f32 intermediates
        )

    budget = _vmem_budget_bytes()
    while tb > 16 and _vmem_needed(tb) > budget:
        tb = max(16, _round_up(tb // 2, 16))
    vmem_limit = int(min(max(2 * _vmem_needed(tb), 32 * 2**20), budget))

    grid = (pl.cdiv(B, tb),)  # ragged last tile: reads padded, writes masked
    return pl.pallas_call(
        _autoencoder_kernel,
        out_shape=jax.ShapeDtypeStruct((B, input_size), out_dtype),
        grid_spec=pltpu.PrefetchScalarGridSpec(
            num_scalar_prefetch=0,
            grid=grid,
            in_specs=[
                pl.BlockSpec((tb, input_size), lambda i: (i, 0)),      # x tile
                pl.BlockSpec((input_size, hidden), lambda i: (0, 0)),  # W1 (full, grid-invariant)
                pl.BlockSpec((1, hidden), lambda i: (0, 0)),           # b1
                pl.BlockSpec((hidden, input_size), lambda i: (0, 0)),  # W2 (full, grid-invariant)
                pl.BlockSpec((1, input_size), lambda i: (0, 0)),       # b2
            ],
            out_specs=pl.BlockSpec((tb, input_size), lambda i: (i, 0)),
        ),
        compiler_params=pltpu.CompilerParams(
            # >=2 batch tiles shard across the two TensorCores on v7x.
            dimension_semantics=("parallel",),
            vmem_limit_bytes=vmem_limit,
        ),
    )(x, w1, b1_2d, w2_in, b2_2d)


def init_params(key, input_size, hidden, weight_dtype=jnp.bfloat16):
    """nn.Linear-style uniform(-1/sqrt(fan_in), +) init.

    Weights are returned pre-transposed to [in, out] and pre-cast to the MXU
    stream dtype (bf16) so the forward pass never pays a per-call weight cast.
    """
    k1, k2, k3, k4 = jax.random.split(key, 4)
    bound1 = 1.0 / jnp.sqrt(input_size)
    bound2 = 1.0 / jnp.sqrt(hidden)
    # encoder: PyTorch weight (hidden, input_size) -> stored as (input_size, hidden)
    w1 = jax.random.uniform(k1, (input_size, hidden), jnp.float32, -bound1, bound1)
    b1 = jax.random.uniform(k2, (hidden,), jnp.float32, -bound1, bound1)
    # decoder: PyTorch weight (input_size, hidden) -> stored as (hidden, input_size)
    w2 = jax.random.uniform(k3, (hidden, input_size), jnp.float32, -bound2, bound2)
    b2 = jax.random.uniform(k4, (input_size,), jnp.float32, -bound2, bound2)
    return w1.astype(weight_dtype), b1, w2.astype(weight_dtype), b2


def reference_forward(x, w1, b1, w2, b2):
    h = jnp.maximum(x @ w1.astype(jnp.float32) + b1, 0.0)
    return jax.nn.sigmoid(h @ w2.astype(jnp.float32) + b2)


if __name__ == "__main__":
    input_size = 256   # module default input_size=256
    hidden = 128       # module default hidenlayer_size=128
    batch = 200        # not a tile multiple -> exercises the ragged last tile

    key = jax.random.PRNGKey(0)
    kx, kp = jax.random.split(key)
    x = jax.random.normal(kx, (batch, input_size), jnp.float32)
    w1, b1, w2, b2 = init_params(kp, input_size, hidden)

    # Default tb=1024 clamps to 112 here -> grid=(2,): two parallel tiles
    # (both v7x TensorCores busy) with a masked ragged second tile (200 rows).
    out = autoencoder_forward(x, w1, b1, w2, b2)
    out = jax.block_until_ready(out)

    ref = reference_forward(x, w1, b1, w2, b2)
    assert out.shape == (batch, input_size)
    assert out.dtype == w1.dtype  # bf16 output path
    # bf16-streamed matmuls + bf16 output store: sigmoid outputs lie in [0,1],
    # so an absolute tolerance is the right check.
    max_err = float(jnp.max(jnp.abs(out.astype(jnp.float32) - ref)))
    assert max_err < 2e-2, f"max abs error {max_err}"

    print("KERNEL_OK")
</pallas_src>

<mosaic_0001>
module attributes {stable_mosaic.version = 11 : i64} {
  func.func @_autoencoder_kernel(%arg0: i32, %arg1: memref<112x256xf32, #tpu.memory_space<vmem>>, %arg2: memref<256x128xbf16, #tpu.memory_space<vmem>>, %arg3: memref<1x128xf32, #tpu.memory_space<vmem>>, %arg4: memref<128x256xbf16, #tpu.memory_space<vmem>>, %arg5: memref<1x256xf32, #tpu.memory_space<vmem>>, %arg6: memref<112x256xbf16, #tpu.memory_space<vmem>>) attributes {dimension_semantics = [#tpu.dimension_semantics<parallel>], iteration_bounds = array<i64: 2>, scalar_prefetch = 0 : i64, scratch_operands = 0 : i64, tpu.core_type = #tpu.core_type<tc>, window_params = [{transform_indices = @transform_0, window_bounds = array<i64: 112, 256>}, {pipeline_mode = #tpu.pipeline_mode<synchronous>, transform_indices = @transform_1, window_bounds = array<i64: 256, 128>}, {pipeline_mode = #tpu.pipeline_mode<synchronous>, transform_indices = @transform_2, window_bounds = array<i64: 1, 128>}, {pipeline_mode = #tpu.pipeline_mode<synchronous>, transform_indices = @transform_3, window_bounds = array<i64: 128, 256>}, {pipeline_mode = #tpu.pipeline_mode<synchronous>, transform_indices = @transform_4, window_bounds = array<i64: 1, 256>}, {transform_indices = @transform_5, window_bounds = array<i64: 112, 256>}]} {
    %c0 = arith.constant 0 : index
    %c0_0 = arith.constant 0 : index
    %0 = vector.load %arg1[%c0, %c0_0] : memref<112x256xf32, #tpu.memory_space<vmem>>, vector<112x256xf32>
    %1 = arith.truncf %0 : vector<112x256xf32> to vector<112x256xbf16>
    %c0_1 = arith.constant 0 : index
    %c0_2 = arith.constant 0 : index
    %2 = vector.load %arg2[%c0_1, %c0_2] : memref<256x128xbf16, #tpu.memory_space<vmem>>, vector<256x128xbf16>
    %cst = arith.constant dense<0.000000e+00> : vector<112x128xf32>
    %3 = tpu.matmul %1, %2, %cst {dimension_numbers = #tpu.dot_dimension_numbers<[1], [0], [0], [1], [0, 0, 1, 1], [], []>} : vector<112x256xbf16>, vector<256x128xbf16>, vector<112x128xf32> -> vector<112x128xf32>
    %c0_3 = arith.constant 0 : index
    %c0_4 = arith.constant 0 : index
    %4 = vector.load %arg3[%c0_3, %c0_4] : memref<1x128xf32, #tpu.memory_space<vmem>>, vector<1x128xf32>
    %5 = vector.broadcast %4 : vector<1x128xf32> to vector<112x128xf32>
    %6 = arith.addf %3, %5 : vector<112x128xf32>
    %cst_5 = arith.constant 0.000000e+00 : f32
    %7 = vector.broadcast %cst_5 : f32 to vector<112x128xf32>
    %8 = arith.maximumf %6, %7 : vector<112x128xf32>
    %9 = arith.truncf %8 : vector<112x128xf32> to vector<112x128xbf16>
    %c0_6 = arith.constant 0 : index
    %c0_7 = arith.constant 0 : index
    %10 = vector.load %arg4[%c0_6, %c0_7] : memref<128x256xbf16, #tpu.memory_space<vmem>>, vector<128x256xbf16>
    %cst_8 = arith.constant dense<0.000000e+00> : vector<112x256xf32>
    %11 = tpu.matmul %9, %10, %cst_8 {dimension_numbers = #tpu.dot_dimension_numbers<[1], [0], [0], [1], [0, 0, 1, 1], [], []>} : vector<112x128xbf16>, vector<128x256xbf16>, vector<112x256xf32> -> vector<112x256xf32>
    %c0_9 = arith.constant 0 : index
    %c0_10 = arith.constant 0 : index
    %12 = vector.load %arg5[%c0_9, %c0_10] : memref<1x256xf32, #tpu.memory_space<vmem>>, vector<1x256xf32>
    %13 = vector.broadcast %12 : vector<1x256xf32> to vector<112x256xf32>
    %14 = arith.addf %11, %13 : vector<112x256xf32>
    %cst_11 = arith.constant 5.000000e-01 : f32
    %15 = vector.broadcast %cst_11 : f32 to vector<112x256xf32>
    %16 = arith.mulf %15, %14 : vector<112x256xf32>
    %17 = math.tanh %16 : vector<112x256xf32>
    %cst_12 = arith.constant 5.000000e-01 : f32
    %18 = vector.broadcast %cst_12 : f32 to vector<112x256xf32>
    %19 = arith.mulf %18, %17 : vector<112x256xf32>
    %cst_13 = arith.constant 5.000000e-01 : f32
    %20 = vector.broadcast %cst_13 : f32 to vector<112x256xf32>
    %21 = arith.addf %19, %20 : vector<112x256xf32>
    %22 = arith.truncf %21 : vector<112x256xf32> to vector<112x256xbf16>
    %c0_14 = arith.constant 0 : index
    %c0_15 = arith.constant 0 : index
    %23 = vector.load %arg6[%c0_14, %c0_15] : memref<112x256xbf16, #tpu.memory_space<vmem>>, vector<112x256xbf16>
    tpu.vector_store %arg6[%c0_14, %c0_15], %22 {strides = array<i32>} : memref<112x256xbf16, #tpu.memory_space<vmem>>, vector<112x256xbf16>,
    return
  }
  func.func @transform_0(%arg0: i32) -> (i32, i32) {
    %c0_i32 = arith.constant 0 : i32
    %c0_i32_0 = arith.constant 0 : i32
    return %arg0, %c0_i32 : i32, i32
  }
  func.func @transform_1(%arg0: i32) -> (i32, i32) {
    %c0_i32 = arith.constant 0 : i32
    %c0_i32_0 = arith.constant 0 : i32
    %c0_i32_1 = arith.constant 0 : i32
    return %c0_i32, %c0_i32_0 : i32, i32
  }
  func.func @transform_2(%arg0: i32) -> (i32, i32) {
    %c0_i32 = arith.constant 0 : i32
    %c0_i32_0 = arith.constant 0 : i32
    %c0_i32_1 = arith.constant 0 : i32
    return %c0_i32, %c0_i32_0 : i32, i32
  }
  func.func @transform_3(%arg0: i32) -> (i32, i32) {
    %c0_i32 = arith.constant 0 : i32
    %c0_i32_0 = arith.constant 0 : i32
    %c0_i32_1 = arith.constant 0 : i32
    return %c0_i32, %c0_i32_0 : i32, i32
  }
  func.func @transform_4(%arg0: i32) -> (i32, i32) {
    %c0_i32 = arith.constant 0 : i32
    %c0_i32_0 = arith.constant 0 : i32
    %c0_i32_1 = arith.constant 0 : i32
    return %c0_i32, %c0_i32_0 : i32, i32
  }
  func.func @transform_5(%arg0: i32) -> (i32, i32) {
    %c0_i32 = arith.constant 0 : i32
    %c0_i32_0 = arith.constant 0 : i32
    return %arg0, %c0_i32 : i32, i32
  }
}

</mosaic_0001>

<bundles_post_ra>
// kernel: autoencoder_forward.1
= control target key start
LH: loop header
LB: loop body
LE: loop exit
PB: predicated region body
PF: predicated region fallthrough
CT: control target
= control target key end

     0   :  { %s1876_s0 = inlined_call_operand.hbm [shape: f32[200,256], index: 0, kind: input, shape index: {}]   ;;  %s1877_s1 = inlined_call_operand.hbm [shape: bf16[256,128], index: 1, kind: input, shape index: {}]   ;;  %s1878_s2 = inlined_call_operand.vmem [shape: f32[1,128], index: 2, kind: input, shape index: {}]   ;;  %s1879_s3 = inlined_call_operand.hbm [shape: bf16[128,256], index: 3, kind: input, shape index: {}]   ;;  %s1880_s4 = inlined_call_operand.vmem [shape: f32[1,256], index: 4, kind: input, shape index: {}]   ;;  %s1881_s5 = inlined_call_operand.hbm [shape: bf16[200,256], index: 5, kind: output, shape index: {}]  }
   0x1   :  { %1884 = sst [smem:[#allocation12_spill]] %s1877_s1 }
   0x2   :  { %1885 = sst [smem:[#allocation13_spill]] %s1879_s3 }
   0x3   :  { %10 = vsyncpa [#allocation3], 0 }
   0x4   :  { %12 = vsyncpa [#allocation3 + $0x1], 0 }
   0x5   :  { %13 = vsyncpa [#allocation6], 0 }
   0x6   :  { %14 = vsyncpa [#allocation4], 0 }
   0x7   :  { %16 = vsyncpa [#allocation4 + $0x1], 0  ;;  %s1573_s18 = smov 0   ;;  %s1575_s19 = smov 0  }
   0x8   :  { %s1577_s20 = smov 0   ;;  %s1579_s21 = smov 0  }
   0x9 LB: > { %s1594_s22 = sadd.s32 4294967295, %s1529_s21   ;;  %s1029_s23 = sadd.s32 4294967294, %s1529_s21   ;;  %s1529_s21 = sphi %s1579_s21, %s1902_s21   ;;  %s1525_s20 = sphi %s1577_s20, %s1901_s20   ;;  %s1521_s19 = sphi %s1575_s19, %s1900_s19   ;;  %s1517_s18 = sphi %s1573_s18, %s1899_s18  }
   0xa   : > { %s1598_s24 = sadd.s32 1, %s1529_s21   ;;  %s29_s25 = sadd.s32 1, %s1525_s20 }
   0xb   : > { %s26_s26 = ssub.s32 %s1529_s21, %s1598_s24  ;;  %p36_p0 = scmp.ne.s32.totalorder %s1525_s20, %s1521_s19 }
   0xc   : > { %p27_p1 = scmp.eq.s32.totalorder %s26_s26, 0  ;;  %p37_p2 = scmp.eq.s32.totalorder %s1529_s21, 0 }
   0xd   : > { %p42_p3 = scmp.ne.s32.totalorder %s1521_s19, %s1517_s18  ;;  %p1883_p4 = scmp.eq.s32.totalorder %s1594_s22, 0 }
   0xe   : > { %s1610_s27 = scalar_select %p27_p1, %s1525_s20, %s29_s25  }
   0xf   : > { %p1612_p5 = por %p37_p2, %p36_p0  ;;  %p1618_p6 = por %p1883_p4, %p42_p3 }
  0x10   : > { %p150_p7 = scmp.eq.s32.totalorder %s1594_s22, 1  ;;  %p156_p8 = scmp.eq.s32.totalorder %s1029_s23, 1 }
  0x11   : > { %p1030_p9 = scmp.ge.s32.totalorder %s1529_s21, 1  ;;  %p163_p10 = scmp.lt.s32.totalorder %s1529_s21, 3 }
  0x12   : > { %p1625_p11 = por %p150_p7, %p36_p0  ;;  %p1629_p12 = por %p156_p8, %p42_p3 }
  0x13   : > { %p1633_p13 = pnand %p1030_p9, %p163_p10  ;;  %s1891_s1 = sld [smem:[#allocation12_spill]] }
  0x14   : > { %s1889_s6 = scalar_select %p1629_p12, 1, 0 }
  0x15   : > { %p1234_p1 = pneg %p1633_p13  ;;  %s1531_s11 = smov [#allocation5]  }
  0x16   : > { %s176_s12 = sshll.u32 %s1531_s11, 4  ;;  %s1892_s3 = sld [smem:[#allocation13_spill]]  ;;  %s177_s12 = int_to_ptr.vmem [resolvable:$true] %s176_s12 }
  0x17   : > { %p1235_p0 = pnand %p1234_p1, %p1883_p4  ;;  %s1532_s16 = smov 64  }
  0x18   : > { %s1533_s17 = smov 4   ;;  %s1534_s23 = smov [#allocation7]  }
  0x19   : > { %s174_s10 = sshll.u32 %s1891_s1, 4  ;;  %s193_s25 = sshll.u32 %s1534_s23, 4  ;;  %s175_s10 = int_to_ptr.hbm [resolvable:$true] %s174_s10  ;;  %s194_s25 = int_to_ptr.vmem [resolvable:$true] %s193_s25 }
  0x1a   : > { %1237 = dma.hbm_to_vmem [thread:$0]  (!%p1235_p0), %s175_s10, 2048, %s177_s12, [#allocation6], %s1532_s16, %s1532_s16, %s1533_s17  }
  0x1b   : > { %s1535_s26 = smov 128   ;;  %s1536_s8 = smov 8  }
  0x1c   : > { %s191_s15 = sshll.u32 %s1892_s3, 4  ;;  %p1882_p2 = scmp.ge.s32.totalorder %s1529_s21, 2  ;;  %s192_s15 = int_to_ptr.hbm [resolvable:$true] %s191_s15 }
  0x1d   : > { %1240 = dma.hbm_to_vmem [thread:$0]  (!%p1235_p0), %s192_s15, 2048, %s194_s25, [#allocation6], %s1535_s26, %s1535_s26, %s1536_s8  }
  0x1e   : > { %206 = sbr.rel (%p1882_p2) target bundleno = 73 (0x49), region = 32 }
  0x23   : > { %209 = sbr.rel (!%p1612_p5) target bundleno = 73 (0x49), region = 36  ;;  %s210_s9 = sand.u32 (%p1612_p5), 1, %s1525_s20  }
  0x24   : > { %s215_s11 = smul.u32 (%p1612_p5), 14, %s1529_s21  ;;  %s1657_s16 = scalar_lea.sflag (%p1612_p5), [#allocation3], %s210_s9 }
  0x25   : > { %s1221_s13 = smul.u32 (%p1612_p5), 224, %s210_s9 }
  0x26   : > { %s216_s10 = ssub.s32 (%p1612_p5), 25, %s215_s11 }
  0x27   : > { %p217_p3 = scmp.lt.s32.totalorder (%p1612_p5), %s216_s10, 14  ;;  %s214_s17 = scalar_lea.vmem (%p1612_p5), [#allocation2], %s1221_s13 }
  0x29   : > { %s1904_s10 = smov (!%p217_p3, %s216_s10), 14 }
  0x2a   : > { %s1181_s12 = sshll.u32 %s1904_s10, 4 }
  0x2b   : > { %s221_s14 = ssub.s32 224, %s1181_s12 }
  0x2c   : > { %s222_s15 = sshll.u32 %s221_s14, 4 }
  0x2d   : > { %223 = vsyncadd %s1657_s16, %s222_s15  ;;  %p1660_p5 = scmp.ne.s32.totalorder %s1181_s12, 0  ;;  %s1219_s23 = smul.u32 224, %s1529_s21 }
  0x2e   : > { %s1665_s25 = sshll.u32 %s214_s17, 4  ;;  %s1040_s26 = sshll.u32 %s1904_s10, 8  ;;  %s232_s25 = int_to_ptr.vmem [resolvable:$true] %s1665_s25 }
  0x2f   : > { %s227_s9 = scalar_lea.hbm %s1876_s0, %s1219_s23  ;;  %s1411_s12 = sshrl.u32 %s1040_s26, 4 }
  0x30   : > { %s229_s13 = sshll.u32 %s227_s9, 4  ;;  %s1420_s3 = scalar_lea.hbm %s1876_s0, 400  ;;  %s1672_s13 = int_to_ptr.hbm [resolvable:$true] %s229_s13 }
  0x31   : > { %s1409_s14 = sshra.s32 %s1672_s13, 4  ;;  %s1410_s14 = int_to_ptr.hbm [resolvable:$true] %s1409_s14 }
  0x32   : > { %s1416_s15 = scalar_lea.hbm %s1410_s14, %s1411_s12  ;;  %p1421_p10 = scmp.lt.s32.totalorder %s1410_s14, %s1876_s0 }
  0x33   : > { %p1417_p7 = scmp.ne.s32.totalorder %s1410_s14, %s1416_s15  ;;  %p1422_p1 = scmp.lt.s32.totalorder %s1420_s3, %s1416_s15 }
  0x35   : > { %p1418_p8 = pnand %p1417_p7, %p1660_p5  ;;  %p1423_p0 = por %p1422_p1, %p1421_p10 }
  0x37   : > { %p1419_p9 = pneg %p1418_p8 }
  0x39   : > { %p1424_p3 = pnand %p1423_p0, %p1419_p9 }
  0x3b   : > { %1427 = shalt.err (!%p1424_p3)
}
  0x3c   : > { %s1428_s11 = sshra.s32 %s232_s25, 4  ;;  %s1537_s1 = smov [#allocation2]   ;;  %s1429_s11 = int_to_ptr.vmem [resolvable:$true] %s1428_s11 }
  0x3d   : > { %s1435_s9 = scalar_lea.vmem %s1429_s11, %s1411_s12  ;;  %s1439_s17 = scalar_lea.vmem %s1537_s1, 448 }
  0x3e   : > { %p1436_p7 = scmp.ne.s32.totalorder %s1429_s11, %s1435_s9  ;;  %p1441_p4 = scmp.lt.s32.totalorder %s1439_s17, %s1435_s9 }
  0x40   : > { %p1437_p8 = pnand %p1436_p7, %p1660_p5 }
  0x42   : > { %p1438_p2 = pneg %p1437_p8 }
  0x44   : > { %p1443_p12 = pnand %p1441_p4, %p1438_p2 }
  0x46   : > { %1446 = shalt.err (!%p1443_p12)
}
  0x47   : > { %s1538_s14 = smov 256   ;;  %s1539_s3 = smov 16  }
  0x48   : > { %237 = dma.hbm_to_vmem [thread:$0]  (%p1660_p5), %s1672_s13, %s1040_s26, %s232_s25, %s1657_s16, %s1538_s14, %s1538_s14, %s1539_s3  }
  0x49 PF: > { %243 = sbr.rel (%p1633_p13) target bundleno = 542 (0x21e), region = 40  ;;  %s1700_s12 = sand.u32 (!%p1633_p13), 1, %s1521_s19  }
  0x4a   : > { %s1222_s15 = smul.u32 (!%p1633_p13), 224, %s1700_s12  ;;  %s246_s8 = scalar_lea.sflag (!%p1633_p13), [#allocation3], %s1700_s12 }
  0x4c   : > { %s1704_s23 = scalar_lea.vmem (!%p1633_p13), [#allocation2], %s1222_s15 }
  0x4e   : > { %1504 = dma.done.wait (%p1618_p6), %s246_s8, 3584  }
  0x4f   : > { %1506 = vsyncadd (%p1618_p6), %s246_s8, 4294963712  ;;  %p1894_p4 = scmp.eq.s32.totalorder %s1594_s22, 0 }
  0x51   : > { %1508 = dma.done.wait (%p1894_p4), [#allocation6], 4096   ;;  %p1895_p12 = pmov %p1894_p4 }
  0x52   : > { %v1191_v0 = vld [vmem:[#allocation5 + $0x38] sm:$0xff]  ;;  %v1190_v2 = vld [vmem:[#allocation5 + $0x30] sm:$0xff]  ;;  %v1189_v4 = vld [vmem:[#allocation5 + $0x28] sm:$0xff]  ;;  %s1223_s28 = smul.u32 112, %s1700_s12  ;;  %s913_s26 = scalar_lea.sflag [#allocation4], %s1700_s12 }
  0x53   : > { %1510 = vsyncadd (%p1895_p12), [#allocation6], 4294963200  ;;  %v1199_v1 = vld [vmem:[#allocation5 + $0x78] sm:$0xff]  ;;  %473 = vmatpush.bf16.msra.mxu0 %v1191_v0  ;;  %v1198_v3 = vld [vmem:[#allocation5 + $0x70] sm:$0xff]  ;;  %s920_s13 = smul.u32 (%p1625_p11), 14, %s1594_s22 }
  0x54   : > { %517 = vmatpush.bf16.msra.mxu1 %v1199_v1  ;;  %v1197_v5 = vld [vmem:[#allocation5 + $0x68] sm:$0xff]  ;;  %v1188_v6 = vld [vmem:[#allocation5 + $0x20] sm:$0xff]  ;;  %v1187_v8 = vld [vmem:[#allocation5 + $0x18] sm:$0xff]  ;;  %s1775_s25 = scalar_lea.vmem [#allocation8], %s1223_s28 }
  0x55   : > { %v1196_v7 = vld [vmem:[#allocation5 + $0x60] sm:$0xff]  ;;  %v1195_v9 = vld [vmem:[#allocation5 + $0x58] sm:$0xff]  ;;  %v1186_v10 = vld [vmem:[#allocation5 + $0x10] sm:$0xff]  ;;  %s921_s11 = ssub.s32 (%p1625_p11), 25, %s920_s13 }
  0x56   : > { %v1194_v11 = vld [vmem:[#allocation5 + $0x50] sm:$0xff]  ;;  %v1185_v12 = vld [vmem:[#allocation5 + $0x8] sm:$0xff]  ;;  %v1184_v14 = vld [vmem:[#allocation5] sm:$0xff]  ;;  %p922_p6 = scmp.lt.s32.totalorder (%p1625_p11), %s921_s11, 14 }
  0x57   : > { %474 = vmatpush.bf16.msra.mxu0 %v1190_v2  ;;  %v1193_v13 = vld [vmem:[#allocation5 + $0x48] sm:$0xff]  ;;  %v1192_v15 = vld [vmem:[#allocation5 + $0x40] sm:$0xff]  ;;  %v301_v17 = vld [vmem:[%s1704_s23 + $0x10] sm:$0xff] }
  0x58   : > { %518 = vmatpush.bf16.msra.mxu1 %v1198_v3  ;;  %v299_v16 = vld [vmem:[%s1704_s23] sm:$0xff]  ;;  %v300_v18 = vld [vmem:[%s1704_s23 + $0x8] sm:$0xff]  ;;  %v302_v19 = vld [vmem:[%s1704_s23 + $0x18] sm:$0xff] }
  0x59   : > { %v327_v20 = vpack.c.bf16 %v301_v17, %v299_v16  ;;  %v328_v21 = vpack.c.bf16 %v302_v19, %v300_v18  ;;  %v303_v22 = vld [vmem:[%s1704_s23 + $0x20] sm:$0xff]  ;;  %v305_v23 = vld [vmem:[%s1704_s23 + $0x30] sm:$0xff]  ;;  %v304_v24 = vld [vmem:[%s1704_s23 + $0x28] sm:$0xff] }
  0x5a   : > { %v306_v25 = vld [vmem:[%s1704_s23 + $0x38] sm:$0xff]  ;;  %v329_v26 = vpack.c.bf16 %v305_v23, %v303_v22  ;;  %v307_v28 = vld [vmem:[%s1704_s23 + $0x40] sm:$0xff]  ;;  %v309_v29 = vld [vmem:[%s1704_s23 + $0x50] sm:$0xff] }
  0x5b   : > { %475 = vmatpush.bf16.msra.mxu0 %v1189_v4  ;;  %v330_v27 = vpack.c.bf16 %v306_v25, %v304_v24  ;;  %v308_v30 = vld [vmem:[%s1704_s23 + $0x48] sm:$0xff]  ;;  %v310_v31 = vld [vmem:[%s1704_s23 + $0x58] sm:$0xff]  ;;  %v331_v32 = vpack.c.bf16 %v309_v29, %v307_v28  ;;  %v311_v34 = vld [vmem:[%s1704_s23 + $0x60] sm:$0xff] }
  0x5c   : > { %519 = vmatpush.bf16.msra.mxu1 %v1197_v5  ;;  %v332_v33 = vpack.c.bf16 %v310_v31, %v308_v30  ;;  %v313_v35 = vld [vmem:[%s1704_s23 + $0x70] sm:$0xff]  ;;  %v312_v36 = vld [vmem:[%s1704_s23 + $0x68] sm:$0xff]  ;;  %v314_v37 = vld [vmem:[%s1704_s23 + $0x78] sm:$0xff] }
  0x5d   : > { %v333_v38 = vpack.c.bf16 %v313_v35, %v311_v34  ;;  %v334_v39 = vpack.c.bf16 %v314_v37, %v312_v36  ;;  %v315_v40 = vld [vmem:[%s1704_s23 + $0x80] sm:$0xff]  ;;  %v317_v41 = vld [vmem:[%s1704_s23 + $0x90] sm:$0xff]  ;;  %v316_v42 = vld [vmem:[%s1704_s23 + $0x88] sm:$0xff] }
  0x5e   : > { %v318_v43 = vld [vmem:[%s1704_s23 + $0x98] sm:$0xff]  ;;  %v335_v44 = vpack.c.bf16 %v317_v41, %v315_v40  ;;  %v1166_v46 = vld [vmem:[#allocation7 + $0x70] sm:$0xf]  ;;  %v1214_v48 = vld [vmem:[#allocation7 + $0x74] sm:$0xf] }
  0x5f   : > { %476 = vmatpush.bf16.msra.mxu0 %v1188_v6  ;;  %v336_v45 = vpack.c.bf16 %v318_v43, %v316_v42  ;;  %v1215_v47 = vld [vmem:[#allocation7 + $0x74] sm:$0xf0]  ;;  %v1168_v50 = vld [vmem:[#allocation7 + $0x78] sm:$0xf0]  ;;  %v1158_v51 = vld [vmem:[#allocation7 + $0x60] sm:$0xf] }
  0x60   : > { %520 = vmatpush.bf16.msra.mxu1 %v1196_v7  ;;  %v1167_v49 = vor.u32 %v1215_v47, %v1166_v46  ;;  %v1213_v52 = vld [vmem:[#allocation7 + $0x64] sm:$0xf0]  ;;  %v1171_v53 = vor.u32 %v1214_v48, %v1168_v50  ;;  %v1212_v54 = vld [vmem:[#allocation7 + $0x64] sm:$0xf]  ;;  %v1160_v55 = vld [vmem:[#allocation7 + $0x68] sm:$0xf0] }
  0x61   : > { %v1159_v56 = vor.u32 %v1213_v52, %v1158_v51  ;;  %v1163_v57 = vor.u32 %v1212_v54, %v1160_v55  ;;  %v1150_v58 = vld [vmem:[#allocation7 + $0x50] sm:$0xf]  ;;  %v1211_v59 = vld [vmem:[#allocation7 + $0x54] sm:$0xf0]  ;;  %v1210_v60 = vld [vmem:[#allocation7 + $0x54] sm:$0xf] }
  0x62   : > { %684 = vmatpush.bf16.msra.mxu2 %v1167_v49  ;;  %728 = vmatpush.bf16.msra.mxu3 %v1171_v53  ;;  %v1152_v61 = vld [vmem:[#allocation7 + $0x58] sm:$0xf0]  ;;  %v1151_v62 = vor.u32 %v1211_v59, %v1150_v58  ;;  %v319_v63 = vld [vmem:[%s1704_s23 + $0xa0] sm:$0xff]  ;;  %v1209_v2 = vld [vmem:[#allocation7 + $0x44] sm:$0xf0] }
  0x63   : > { %477 = vmatpush.bf16.msra.mxu0 %v1187_v8  ;;  %v1155_v0 = vor.u32 %v1210_v60, %v1152_v61  ;;  %v1142_v1 = vld [vmem:[#allocation7 + $0x40] sm:$0xf]  ;;  %v321_v3 = vld [vmem:[%s1704_s23 + $0xb0] sm:$0xff]  ;;  %v320_v4 = vld [vmem:[%s1704_s23 + $0xa8] sm:$0xff] }
  0x64   : > { %521 = vmatpush.bf16.msra.mxu1 %v1195_v9  ;;  %v322_v5 = vld [vmem:[%s1704_s23 + $0xb8] sm:$0xff]  ;;  %v1208_v6 = vld [vmem:[#allocation7 + $0x44] sm:$0xf]  ;;  %v1144_v7 = vld [vmem:[#allocation7 + $0x48] sm:$0xf0]  ;;  %v1143_v8 = vor.u32 %v1209_v2, %v1142_v1  ;;  %v337_v9 = vpack.c.bf16 %v321_v3, %v319_v63 }
  0x65   : > { %v1134_v18 = vld [vmem:[#allocation7 + $0x30] sm:$0xf]  ;;  %v1207_v19 = vld [vmem:[#allocation7 + $0x34] sm:$0xf0]  ;;  %v1136_v22 = vld [vmem:[#allocation7 + $0x38] sm:$0xf0] }
  0x66   : > { %685 = vmatpush.bf16.msra.mxu2 %v1159_v56  ;;  %729 = vmatpush.bf16.msra.mxu3 %v1163_v57  ;;  %v1126_v24 = vld [vmem:[#allocation7 + $0x20] sm:$0xf]  ;;  %v1205_v25 = vld [vmem:[#allocation7 + $0x24] sm:$0xf0]  ;;  %v1128_v28 = vld [vmem:[#allocation7 + $0x28] sm:$0xf0] }
  0x67   : > { %478 = vmatpush.bf16.msra.mxu0 %v1186_v10  ;;  %v338_v10 = vpack.c.bf16 %v322_v5, %v320_v4  ;;  %v1118_v30 = vld [vmem:[#allocation7 + $0x10] sm:$0xf]  ;;  %v1203_v31 = vld [vmem:[#allocation7 + $0x14] sm:$0xf0]  ;;  %v1120_v34 = vld [vmem:[#allocation7 + $0x18] sm:$0xf0] }
  0x68   : > { %522 = vmatpush.bf16.msra.mxu1 %v1194_v11  ;;  %v1147_v11 = vor.u32 %v1208_v6, %v1144_v7  ;;  %v1110_v36 = vld [vmem:[#allocation7] sm:$0xf]  ;;  %v1201_v37 = vld [vmem:[#allocation7 + $0x4] sm:$0xf0]  ;;  %v1112_v40 = vld [vmem:[#allocation7 + $0x8] sm:$0xf0] }
  0x6a   : > { %686 = vmatpush.bf16.msra.mxu2 %v1151_v62  ;;  %730 = vmatpush.bf16.msra.mxu3 %v1155_v0 }
  0x6b   : > { %479 = vmatpush.bf16.msra.mxu0 %v1185_v12  ;;  %v323_v12 = vld [vmem:[%s1704_s23 + $0xc0] sm:$0xff] }
  0x6c   : > { %523 = vmatpush.bf16.msra.mxu1 %v1193_v13  ;;  %v325_v13 = vld [vmem:[%s1704_s23 + $0xd0] sm:$0xff] }
  0x6d   : > { %v339_v16 = vpack.c.bf16 %v325_v13, %v323_v12 }
  0x6e   : > { %687 = vmatpush.bf16.msra.mxu2 %v1143_v8  ;;  %731 = vmatpush.bf16.msra.mxu3 %v1147_v11 }
  0x6f   : > { %480 = vmatpush.bf16.msra.mxu0 %v1184_v14  ;;  %v324_v14 = vld [vmem:[%s1704_s23 + $0xc8] sm:$0xff] }
  0x70   : > { %524 = vmatpush.bf16.msra.mxu1 %v1192_v15  ;;  %v326_v15 = vld [vmem:[%s1704_s23 + $0xd8] sm:$0xff] }
  0x71   : > { %v340_v17 = vpack.c.bf16 %v326_v15, %v324_v14 }
  0x72   : > { %481 = vmatmul.bf16.vlgmr.msra.gmra.mxu0 %v327_v20  ;;  %v1206_v20 = vld [vmem:[#allocation7 + $0x34] sm:$0xf] }
  0x73   : > { %525 = vmatmul.bf16.vlgmr.msra.gmra.mxu1 %v328_v21  ;;  %v1135_v21 = vor.u32 %v1207_v19, %v1134_v18  ;;  %v1139_v23 = vor.u32 %v1206_v20, %v1136_v22 }
  0x75   : > { %688 = vmatpush.bf16.msra.mxu2 %v1135_v21  ;;  %732 = vmatpush.bf16.msra.mxu3 %v1139_v23 }
  0x82   : > { %486 = vmatmul.bf16.gmra.mxu0 %v329_v26  ;;  %v1204_v26 = vld [vmem:[#allocation7 + $0x24] sm:$0xf] }
  0x83   : > { %530 = vmatmul.bf16.gmra.mxu1 %v330_v27  ;;  %v1127_v27 = vor.u32 %v1205_v25, %v1126_v24  ;;  %v1131_v29 = vor.u32 %v1204_v26, %v1128_v28 }
  0x85   : > { %689 = vmatpush.bf16.msra.mxu2 %v1127_v27  ;;  %733 = vmatpush.bf16.msra.mxu3 %v1131_v29 }
  0x92   : > { %491 = vmatmul.bf16.gmra.mxu0 %v331_v32  ;;  %v1202_v32 = vld [vmem:[#allocation7 + $0x14] sm:$0xf] }
  0x93   : > { %535 = vmatmul.bf16.gmra.mxu1 %v332_v33  ;;  %v1119_v33 = vor.u32 %v1203_v31, %v1118_v30  ;;  %v1123_v35 = vor.u32 %v1202_v32, %v1120_v34 }
  0x95   : > { %690 = vmatpush.bf16.msra.mxu2 %v1119_v33  ;;  %734 = vmatpush.bf16.msra.mxu3 %v1123_v35 }
  0xa2   : > { %496 = vmatmul.bf16.gmra.mxu0 %v333_v38  ;;  %v1200_v38 = vld [vmem:[#allocation7 + $0x4] sm:$0xf] }
  0xa3   : > { %540 = vmatmul.bf16.gmra.mxu1 %v334_v39  ;;  %v1111_v39 = vor.u32 %v1201_v37, %v1110_v36  ;;  %v1115_v41 = vor.u32 %v1200_v38, %v1112_v40 }
  0xa5   : > { %691 = vmatpush.bf16.msra.mxu2 %v1111_v39  ;;  %735 = vmatpush.bf16.msra.mxu3 %v1115_v41 }
  0xb2   : > { %501 = vmatmul.bf16.gmra.mxu0 %v335_v44  ;;  %v1745_v44 = vld [vmem:[%s1878_s2] ss:$0 sm:$0xff] }
  0xb3   : > { %545 = vmatmul.bf16.gmra.mxu1 %v336_v45 }
  0xc2   : > { %506 = vmatmul.bf16.gmra.mxu0 %v337_v9 }
  0xc3   : > { %550 = vmatmul.bf16.gmra.mxu1 %v338_v10 }
  0xd2   : > { %511 = vmatmul.bf16.gmra.mxu0 %v339_v16 }
  0xd3   : > { %555 = vmatmul.bf16.gmra.mxu1 %v340_v17 }
  0xef   : > { %v482_v42 = vpop.f32.mrf.mxu0 }
  0xf0   : > { %v526_v43 = vpop.f32.mrf.mxu1  ;;  %v483_v45 = vadd.f32 %v1745_v44, %v482_v42 }
  0xf2   : > { %v527_v48 = vadd.f32 %v526_v43, %v483_v45 }
  0xf4   : > { %v561_v51 = vmax.f32 %v527_v48, 0.0 }
  0xf7   : > { %v484_v46 = vpop.f32.mrf.mxu0 }
  0xf8   : > { %v528_v47 = vpop.f32.mrf.mxu1  ;;  %v485_v49 = vadd.f32 %v1745_v44, %v484_v46 }
  0xfa   : > { %v529_v50 = vadd.f32 %v528_v47, %v485_v49 }
  0xfc   : > { %v562_v52 = vmax.f32 %v529_v50, 0.0 }
  0xfe   : > { %v575_v53 = vpack.c.bf16 %v562_v52, %v561_v51 }
  0xff   : > { %v487_v54 = vpop.f32.mrf.mxu0 }
 0x100   : > { %v531_v55 = vpop.f32.mrf.mxu1  ;;  %692 = vmatmul.bf16.vlgmr.msra.gmra.mxu2 %v575_v53  ;;  %736 = vmatmul.bf16.vlgmr.msra.gmra.mxu3 %v575_v53  ;;  %v488_v56 = vadd.f32 %v1745_v44, %v487_v54 }
 0x102   : > { %v532_v59 = vadd.f32 %v531_v55, %v488_v56 }
 0x104   : > { %v563_v62 = vmax.f32 %v532_v59, 0.0 }
 0x107   : > { %v489_v57 = vpop.f32.mrf.mxu0 }
 0x108   : > { %v533_v58 = vpop.f32.mrf.mxu1  ;;  %v490_v60 = vadd.f32 %v1745_v44, %v489_v57  ;;  %v598_v57 = vld [vmem:[%s1880_s4] sm:$0x3] }
 0x109   : > { %v1766_v59 = vperm.slane %v598_v57, 1 }
 0x10a   : > { %v534_v61 = vadd.f32 %v533_v58, %v490_v60  ;;  %v1764_v58 = vperm.slane %v598_v57, 0 }
 0x10c   : > { %v564_v63 = vmax.f32 %v534_v61, 0.0 }
 0x10e   : > { %v576_v0 = vpack.c.bf16 %v564_v63, %v563_v62 }
 0x10f   : > { %v492_v1 = vpop.f32.mrf.mxu0 }
 0x110   : > { %v536_v2 = vpop.f32.mrf.mxu1  ;;  %697 = vmatmul.bf16.gmra.mxu2 %v576_v0  ;;  %741 = vmatmul.bf16.gmra.mxu3 %v576_v0  ;;  %v493_v3 = vadd.f32 %v1745_v44, %v492_v1 }
 0x112   : > { %v537_v6 = vadd.f32 %v536_v2, %v493_v3 }
 0x114   : > { %v565_v9 = vmax.f32 %v537_v6, 0.0 }
 0x117   : > { %v494_v4 = vpop.f32.mrf.mxu0 }
 0x118   : > { %v538_v5 = vpop.f32.mrf.mxu1  ;;  %v495_v7 = vadd.f32 %v1745_v44, %v494_v4 }
 0x11a   : > { %v539_v8 = vadd.f32 %v538_v5, %v495_v7 }
 0x11c   : > { %v566_v10 = vmax.f32 %v539_v8, 0.0 }
 0x11e   : > { %v577_v11 = vpack.c.bf16 %v566_v10, %v565_v9 }
 0x11f   : > { %v497_v12 = vpop.f32.mrf.mxu0 }
 0x120   : > { %v541_v13 = vpop.f32.mrf.mxu1  ;;  %702 = vmatmul.bf16.gmra.mxu2 %v577_v11  ;;  %746 = vmatmul.bf16.gmra.mxu3 %v577_v11  ;;  %v498_v14 = vadd.f32 %v1745_v44, %v497_v12 }
 0x122   : > { %v542_v17 = vadd.f32 %v541_v13, %v498_v14 }
 0x124   : > { %v567_v20 = vmax.f32 %v542_v17, 0.0 }
 0x127   : > { %v499_v15 = vpop.f32.mrf.mxu0 }
 0x128   : > { %v543_v16 = vpop.f32.mrf.mxu1  ;;  %v500_v18 = vadd.f32 %v1745_v44, %v499_v15 }
 0x12a   : > { %v544_v19 = vadd.f32 %v543_v16, %v500_v18 }
 0x12c   : > { %v568_v21 = vmax.f32 %v544_v19, 0.0 }
 0x12e   : > { %v578_v22 = vpack.c.bf16 %v568_v21, %v567_v20 }
 0x12f   : > { %v502_v23 = vpop.f32.mrf.mxu0 }
 0x130   : > { %v546_v24 = vpop.f32.mrf.mxu1  ;;  %707 = vmatmul.bf16.gmra.mxu2 %v578_v22  ;;  %751 = vmatmul.bf16.gmra.mxu3 %v578_v22  ;;  %v503_v25 = vadd.f32 %v1745_v44, %v502_v23 }
 0x132   : > { %v547_v28 = vadd.f32 %v546_v24, %v503_v25 }
 0x134   : > { %v569_v31 = vmax.f32 %v547_v28, 0.0 }
 0x137   : > { %v504_v26 = vpop.f32.mrf.mxu0 }
 0x138   : > { %v548_v27 = vpop.f32.mrf.mxu1  ;;  %v505_v29 = vadd.f32 %v1745_v44, %v504_v26 }
 0x13a   : > { %v549_v30 = vadd.f32 %v548_v27, %v505_v29 }
 0x13c   : > { %v570_v32 = vmax.f32 %v549_v30, 0.0 }
 0x13e   : > { %v579_v33 = vpack.c.bf16 %v570_v32, %v569_v31 }
 0x13f   : > { %v507_v34 = vpop.f32.mrf.mxu0 }
 0x140   : > { %v551_v35 = vpop.f32.mrf.mxu1  ;;  %712 = vmatmul.bf16.gmra.mxu2 %v579_v33  ;;  %756 = vmatmul.bf16.gmra.mxu3 %v579_v33  ;;  %v508_v36 = vadd.f32 %v1745_v44, %v507_v34 }
 0x142   : > { %v552_v39 = vadd.f32 %v551_v35, %v508_v36 }
 0x144   : > { %v571_v42 = vmax.f32 %v552_v39, 0.0 }
 0x147   : > { %v509_v37 = vpop.f32.mrf.mxu0 }
 0x148   : > { %v553_v38 = vpop.f32.mrf.mxu1  ;;  %v510_v40 = vadd.f32 %v1745_v44, %v509_v37 }
 0x14a   : > { %v554_v41 = vadd.f32 %v553_v38, %v510_v40 }
 0x14c   : > { %v572_v43 = vmax.f32 %v554_v41, 0.0 }
 0x14e   : > { %v580_v45 = vpack.c.bf16 %v572_v43, %v571_v42 }
 0x14f   : > { %v512_v46 = vpop.f32.mrf.mxu0 }
 0x150   : > { %v556_v47 = vpop.f32.mrf.mxu1  ;;  %717 = vmatmul.bf16.gmra.mxu2 %v580_v45  ;;  %761 = vmatmul.bf16.gmra.mxu3 %v580_v45  ;;  %v513_v48 = vadd.f32 %v1745_v44, %v512_v46 }
 0x152   : > { %v557_v50 = vadd.f32 %v556_v47, %v513_v48 }
 0x154   : > { %v573_v54 = vmax.f32 %v557_v50, 0.0 }
 0x157   : > { %v514_v49 = vpop.f32.mrf.mxu0 }
 0x158   : > { %v515_v51 = vadd.f32 %v1745_v44, %v514_v49  ;;  %v558_v52 = vpop.f32.mrf.mxu1 }
 0x15a   : > { %v559_v53 = vadd.f32 %v558_v52, %v515_v51 }
 0x15c   : > { %v574_v55 = vmax.f32 %v559_v53, 0.0 }
 0x15e   : > { %v581_v56 = vpack.c.bf16 %v574_v55, %v573_v54 }
 0x160   : > { %722 = vmatmul.bf16.gmra.mxu2 %v581_v56  ;;  %766 = vmatmul.bf16.gmra.mxu3 %v581_v56 }
 0x183   : > { %v693_v60 = vpop.f32.mrf.mxu2  ;;  %v737_v61 = vpop.f32.mrf.mxu3 }
 0x184   : > { %v694_v44 = vadd.f32 %v693_v60, %v1764_v58  ;;  %v738_v62 = vadd.f32 %v737_v61, %v1766_v59 }
 0x186   : > { %v772_v63 = vmul.f32 0.5, %v694_v44  ;;  %v773_v0 = vmul.f32 0.5, %v738_v62 }
 0x188   : > { %1293 = vtanh.f32 %v772_v63 }
 0x189   : > { %1295 = vtanh.f32 %v773_v0 }
 0x18b   : > { %v695_v1 = vpop.f32.mrf.mxu2  ;;  %v739_v2 = vpop.f32.mrf.mxu3 }
 0x18c   : > { %v696_v3 = vadd.f32 %v695_v1, %v1764_v58  ;;  %v740_v4 = vadd.f32 %v739_v2, %v1766_v59 }
 0x18e   : > { %v1294_v5 = vpop.eup %1293  ;;  %v774_v6 = vmul.f32 0.5, %v696_v3  ;;  %v775_v7 = vmul.f32 0.5, %v740_v4 }
 0x18f   : > { %v1296_v8 = vpop.eup %1295  ;;  %v828_v9 = vmul.f32 0.5, %v1294_v5 }
 0x190   : > { %v829_v10 = vmul.f32 0.5, %v1296_v8  ;;  %1297 = vtanh.f32 %v774_v6 }
 0x191   : > { %v856_v11 = vadd.f32 0.5, %v828_v9  ;;  %1299 = vtanh.f32 %v775_v7 }
 0x192   : > { %v857_v12 = vadd.f32 0.5, %v829_v10 }
 0x193   : > { %v698_v13 = vpop.f32.mrf.mxu2  ;;  %v742_v14 = vpop.f32.mrf.mxu3 }
 0x194   : > { %v884_v15 = vpack.c.bf16 %v857_v12, %v856_v11  ;;  %v699_v16 = vadd.f32 %v698_v13, %v1764_v58  ;;  %v743_v17 = vadd.f32 %v742_v14, %v1766_v59 }
 0x196   : > { %v1298_v18 = vpop.eup %1297  ;;  %898 = vst [vmem:[%s1775_s25] sm:$0xff] %v884_v15  ;;  %v776_v19 = vmul.f32 0.5, %v699_v16  ;;  %v777_v20 = vmul.f32 0.5, %v743_v17 }
 0x197   : > { %v1300_v21 = vpop.eup %1299  ;;  %v830_v22 = vmul.f32 0.5, %v1298_v18 }
 0x198   : > { %v831_v23 = vmul.f32 0.5, %v1300_v21  ;;  %1301 = vtanh.f32 %v776_v19 }
 0x199   : > { %v858_v24 = vadd.f32 0.5, %v830_v22  ;;  %1303 = vtanh.f32 %v777_v20 }
 0x19a   : > { %v859_v25 = vadd.f32 0.5, %v831_v23 }
 0x19b   : > { %v700_v26 = vpop.f32.mrf.mxu2  ;;  %v744_v27 = vpop.f32.mrf.mxu3 }
 0x19c   : > { %v885_v28 = vpack.c.bf16 %v859_v25, %v858_v24  ;;  %v701_v29 = vadd.f32 %v700_v26, %v1764_v58  ;;  %v745_v30 = vadd.f32 %v744_v27, %v1766_v59 }
 0x19e   : > { %v1302_v31 = vpop.eup %1301  ;;  %899 = vst [vmem:[%s1775_s25 + $0x8] sm:$0xff] %v885_v28  ;;  %v778_v32 = vmul.f32 0.5, %v701_v29  ;;  %v779_v33 = vmul.f32 0.5, %v745_v30 }
 0x19f   : > { %v1304_v34 = vpop.eup %1303  ;;  %v832_v35 = vmul.f32 0.5, %v1302_v31 }
 0x1a0   : > { %v833_v36 = vmul.f32 0.5, %v1304_v34  ;;  %1305 = vtanh.f32 %v778_v32 }
 0x1a1   : > { %v860_v37 = vadd.f32 0.5, %v832_v35  ;;  %1307 = vtanh.f32 %v779_v33 }
 0x1a2   : > { %v861_v38 = vadd.f32 0.5, %v833_v36 }
 0x1a3   : > { %v703_v39 = vpop.f32.mrf.mxu2  ;;  %v747_v40 = vpop.f32.mrf.mxu3 }
 0x1a4   : > { %v886_v41 = vpack.c.bf16 %v861_v38, %v860_v37  ;;  %v704_v42 = vadd.f32 %v703_v39, %v1764_v58  ;;  %v748_v43 = vadd.f32 %v747_v40, %v1766_v59 }
 0x1a6   : > { %v1306_v45 = vpop.eup %1305  ;;  %900 = vst [vmem:[%s1775_s25 + $0x10] sm:$0xff] %v886_v41  ;;  %v780_v46 = vmul.f32 0.5, %v704_v42  ;;  %v781_v47 = vmul.f32 0.5, %v748_v43 }
 0x1a7   : > { %v1308_v48 = vpop.eup %1307  ;;  %v834_v49 = vmul.f32 0.5, %v1306_v45 }
 0x1a8   : > { %v835_v50 = vmul.f32 0.5, %v1308_v48  ;;  %1309 = vtanh.f32 %v780_v46 }
 0x1a9   : > { %v862_v51 = vadd.f32 0.5, %v834_v49  ;;  %1311 = vtanh.f32 %v781_v47 }
 0x1aa   : > { %v863_v52 = vadd.f32 0.5, %v835_v50 }
 0x1ab   : > { %v705_v53 = vpop.f32.mrf.mxu2  ;;  %v749_v54 = vpop.f32.mrf.mxu3 }
 0x1ac   : > { %v887_v55 = vpack.c.bf16 %v863_v52, %v862_v51  ;;  %v706_v56 = vadd.f32 %v705_v53, %v1764_v58  ;;  %v750_v57 = vadd.f32 %v749_v54, %v1766_v59 }
 0x1ae   : > { %v1310_v60 = vpop.eup %1309  ;;  %901 = vst [vmem:[%s1775_s25 + $0x18] sm:$0xff] %v887_v55  ;;  %v782_v61 = vmul.f32 0.5, %v706_v56  ;;  %v783_v44 = vmul.f32 0.5, %v750_v57 }
 0x1af   : > { %v1312_v62 = vpop.eup %1311  ;;  %v836_v63 = vmul.f32 0.5, %v1310_v60 }
 0x1b0   : > { %v837_v0 = vmul.f32 0.5, %v1312_v62  ;;  %1313 = vtanh.f32 %v782_v61 }
 0x1b1   : > { %v864_v1 = vadd.f32 0.5, %v836_v63  ;;  %1315 = vtanh.f32 %v783_v44 }
 0x1b2   : > { %v865_v2 = vadd.f32 0.5, %v837_v0 }
 0x1b3   : > { %v708_v3 = vpop.f32.mrf.mxu2  ;;  %v752_v4 = vpop.f32.mrf.mxu3 }
 0x1b4   : > { %v888_v5 = vpack.c.bf16 %v865_v2, %v864_v1  ;;  %v709_v6 = vadd.f32 %v708_v3, %v1764_v58  ;;  %v753_v7 = vadd.f32 %v752_v4, %v1766_v59 }
 0x1b6   : > { %v1314_v8 = vpop.eup %1313  ;;  %902 = vst [vmem:[%s1775_s25 + $0x20] sm:$0xff] %v888_v5  ;;  %v784_v9 = vmul.f32 0.5, %v709_v6  ;;  %v785_v10 = vmul.f32 0.5, %v753_v7 }
 0x1b7   : > { %v1316_v11 = vpop.eup %1315  ;;  %v838_v12 = vmul.f32 0.5, %v1314_v8 }
 0x1b8   : > { %v839_v13 = vmul.f32 0.5, %v1316_v11  ;;  %1317 = vtanh.f32 %v784_v9 }
 0x1b9   : > { %v866_v14 = vadd.f32 0.5, %v838_v12  ;;  %1319 = vtanh.f32 %v785_v10 }
 0x1ba   : > { %v867_v15 = vadd.f32 0.5, %v839_v13 }
 0x1bb   : > { %v710_v16 = vpop.f32.mrf.mxu2  ;;  %v754_v17 = vpop.f32.mrf.mxu3 }
 0x1bc   : > { %v889_v18 = vpack.c.bf16 %v867_v15, %v866_v14  ;;  %v711_v19 = vadd.f32 %v710_v16, %v1764_v58  ;;  %v755_v20 = vadd.f32 %v754_v17, %v1766_v59 }
 0x1be   : > { %v1318_v21 = vpop.eup %1317  ;;  %903 = vst [vmem:[%s1775_s25 + $0x28] sm:$0xff] %v889_v18  ;;  %v786_v22 = vmul.f32 0.5, %v711_v19  ;;  %v787_v23 = vmul.f32 0.5, %v755_v20 }
 0x1bf   : > { %v1320_v24 = vpop.eup %1319  ;;  %v840_v25 = vmul.f32 0.5, %v1318_v21 }
 0x1c0   : > { %v841_v26 = vmul.f32 0.5, %v1320_v24  ;;  %1321 = vtanh.f32 %v786_v22 }
 0x1c1   : > { %v868_v27 = vadd.f32 0.5, %v840_v25  ;;  %1323 = vtanh.f32 %v787_v23 }
 0x1c2   : > { %v869_v28 = vadd.f32 0.5, %v841_v26 }
 0x1c3   : > { %v713_v29 = vpop.f32.mrf.mxu2  ;;  %v757_v30 = vpop.f32.mrf.mxu3 }
 0x1c4   : > { %v890_v31 = vpack.c.bf16 %v869_v28, %v868_v27  ;;  %v714_v32 = vadd.f32 %v713_v29, %v1764_v58  ;;  %v758_v33 = vadd.f32 %v757_v30, %v1766_v59 }
 0x1c6   : > { %v1322_v34 = vpop.eup %1321  ;;  %904 = vst [vmem:[%s1775_s25 + $0x30] sm:$0xff] %v890_v31  ;;  %v788_v35 = vmul.f32 0.5, %v714_v32  ;;  %v789_v36 = vmul.f32 0.5, %v758_v33 }
 0x1c7   : > { %v1324_v37 = vpop.eup %1323  ;;  %v842_v38 = vmul.f32 0.5, %v1322_v34 }
 0x1c8   : > { %v843_v39 = vmul.f32 0.5, %v1324_v37  ;;  %1325 = vtanh.f32 %v788_v35 }
 0x1c9   : > { %v870_v40 = vadd.f32 0.5, %v842_v38  ;;  %1327 = vtanh.f32 %v789_v36 }
 0x1ca   : > { %v871_v41 = vadd.f32 0.5, %v843_v39 }
 0x1cb   : > { %v715_v42 = vpop.f32.mrf.mxu2  ;;  %v759_v43 = vpop.f32.mrf.mxu3 }
 0x1cc   : > { %v891_v45 = vpack.c.bf16 %v871_v41, %v870_v40  ;;  %v716_v46 = vadd.f32 %v715_v42, %v1764_v58  ;;  %v760_v47 = vadd.f32 %v759_v43, %v1766_v59 }
 0x1ce   : > { %v1326_v48 = vpop.eup %1325  ;;  %905 = vst [vmem:[%s1775_s25 + $0x38] sm:$0xff] %v891_v45  ;;  %v790_v49 = vmul.f32 0.5, %v716_v46  ;;  %v791_v50 = vmul.f32 0.5, %v760_v47 }
 0x1cf   : > { %v1328_v51 = vpop.eup %1327  ;;  %v844_v52 = vmul.f32 0.5, %v1326_v48 }
 0x1d0   : > { %v845_v53 = vmul.f32 0.5, %v1328_v51  ;;  %1329 = vtanh.f32 %v790_v49 }
 0x1d1   : > { %v872_v54 = vadd.f32 0.5, %v844_v52  ;;  %1331 = vtanh.f32 %v791_v50 }
 0x1d2   : > { %v873_v55 = vadd.f32 0.5, %v845_v53 }
 0x1d3   : > { %v718_v56 = vpop.f32.mrf.mxu2  ;;  %v762_v57 = vpop.f32.mrf.mxu3 }
 0x1d4   : > { %v892_v60 = vpack.c.bf16 %v873_v55, %v872_v54  ;;  %v719_v61 = vadd.f32 %v718_v56, %v1764_v58  ;;  %v763_v44 = vadd.f32 %v762_v57, %v1766_v59 }
 0x1d6   : > { %v1330_v62 = vpop.eup %1329  ;;  %906 = vst [vmem:[%s1775_s25 + $0x40] sm:$0xff] %v892_v60  ;;  %v792_v63 = vmul.f32 0.5, %v719_v61  ;;  %v793_v0 = vmul.f32 0.5, %v763_v44 }
 0x1d7   : > { %v1332_v1 = vpop.eup %1331  ;;  %v846_v2 = vmul.f32 0.5, %v1330_v62 }
 0x1d8   : > { %v847_v3 = vmul.f32 0.5, %v1332_v1  ;;  %1333 = vtanh.f32 %v792_v63 }
 0x1d9   : > { %v874_v4 = vadd.f32 0.5, %v846_v2  ;;  %1335 = vtanh.f32 %v793_v0 }
 0x1da   : > { %v875_v5 = vadd.f32 0.5, %v847_v3 }
 0x1db   : > { %v720_v6 = vpop.f32.mrf.mxu2  ;;  %v764_v7 = vpop.f32.mrf.mxu3 }
 0x1dc   : > { %v893_v8 = vpack.c.bf16 %v875_v5, %v874_v4  ;;  %v721_v9 = vadd.f32 %v720_v6, %v1764_v58  ;;  %v765_v10 = vadd.f32 %v764_v7, %v1766_v59 }
 0x1de   : > { %v1334_v11 = vpop.eup %1333  ;;  %907 = vst [vmem:[%s1775_s25 + $0x48] sm:$0xff] %v893_v8  ;;  %v794_v12 = vmul.f32 0.5, %v721_v9  ;;  %v795_v13 = vmul.f32 0.5, %v765_v10 }
 0x1df   : > { %v1336_v14 = vpop.eup %1335  ;;  %v848_v15 = vmul.f32 0.5, %v1334_v11 }
 0x1e0   : > { %v849_v16 = vmul.f32 0.5, %v1336_v14  ;;  %1337 = vtanh.f32 %v794_v12 }
 0x1e1   : > { %v876_v17 = vadd.f32 0.5, %v848_v15  ;;  %1339 = vtanh.f32 %v795_v13 }
 0x1e2   : > { %v877_v18 = vadd.f32 0.5, %v849_v16 }
 0x1e3   : > { %v723_v19 = vpop.f32.mrf.mxu2  ;;  %v767_v20 = vpop.f32.mrf.mxu3 }
 0x1e4   : > { %v894_v21 = vpack.c.bf16 %v877_v18, %v876_v17  ;;  %v724_v22 = vadd.f32 %v723_v19, %v1764_v58  ;;  %v768_v23 = vadd.f32 %v767_v20, %v1766_v59 }
 0x1e6   : > { %v1338_v24 = vpop.eup %1337  ;;  %908 = vst [vmem:[%s1775_s25 + $0x50] sm:$0xff] %v894_v21  ;;  %v796_v25 = vmul.f32 0.5, %v724_v22  ;;  %v797_v26 = vmul.f32 0.5, %v768_v23 }
 0x1e7   : > { %v1340_v27 = vpop.eup %1339  ;;  %v850_v28 = vmul.f32 0.5, %v1338_v24 }
 0x1e8   : > { %v851_v29 = vmul.f32 0.5, %v1340_v27  ;;  %1341 = vtanh.f32 %v796_v25 }
 0x1e9   : > { %v878_v30 = vadd.f32 0.5, %v850_v28  ;;  %1343 = vtanh.f32 %v797_v26 }
 0x1ea   : > { %v879_v31 = vadd.f32 0.5, %v851_v29 }
 0x1eb   : > { %v725_v32 = vpop.f32.mrf.mxu2  ;;  %v769_v33 = vpop.f32.mrf.mxu3 }
 0x1ec   : > { %v895_v34 = vpack.c.bf16 %v879_v31, %v878_v30  ;;  %v726_v35 = vadd.f32 %v725_v32, %v1764_v58  ;;  %v770_v36 = vadd.f32 %v769_v33, %v1766_v59 }
 0x1ee   : > { %v1342_v37 = vpop.eup %1341  ;;  %909 = vst [vmem:[%s1775_s25 + $0x58] sm:$0xff] %v895_v34  ;;  %v798_v38 = vmul.f32 0.5, %v726_v35  ;;  %v799_v39 = vmul.f32 0.5, %v770_v36 }
 0x1ef   : > { %v1344_v40 = vpop.eup %1343  ;;  %v852_v41 = vmul.f32 0.5, %v1342_v37 }
 0x1f0   : > { %v853_v42 = vmul.f32 0.5, %v1344_v40  ;;  %1345 = vtanh.f32 %v798_v38 }
 0x1f1   : > { %v880_v43 = vadd.f32 0.5, %v852_v41  ;;  %1347 = vtanh.f32 %v799_v39 }
 0x1f2   : > { %v881_v45 = vadd.f32 0.5, %v853_v42 }
 0x1f4   : > { %v896_v46 = vpack.c.bf16 %v881_v45, %v880_v43 }
 0x1f6   : > { %v1346_v47 = vpop.eup %1345  ;;  %910 = vst [vmem:[%s1775_s25 + $0x60] sm:$0xff] %v896_v46 }
 0x1f7   : > { %v1348_v48 = vpop.eup %1347  ;;  %v854_v58 = vmul.f32 0.5, %v1346_v47 }
 0x1f8   : > { %v855_v49 = vmul.f32 0.5, %v1348_v48 }
 0x1f9   : > { %v882_v59 = vadd.f32 0.5, %v854_v58 }
 0x1fa   : > { %v883_v50 = vadd.f32 0.5, %v855_v49  ;;  %919 = sbr.rel (!%p1625_p11) target bundleno = 542 (0x21e), region = 56 }
 0x1fc   : > { %v897_v51 = vpack.c.bf16 %v883_v50, %v882_v59 }
 0x1fe   : > { %911 = vst [vmem:[%s1775_s25 + $0x68] sm:$0xff] %v897_v51 }
 0x1ff   : > { %s1906_s11 = smov (!%p922_p6, %s921_s11), 14 }
 0x200   : > { %s1216_s9 = sshll.u32 %s1906_s11, 3 }
 0x201   : > { %s926_s1 = ssub.s32 112, %s1216_s9 }
 0x202   : > { %s927_s17 = sshll.u32 %s926_s1, 4 }
 0x203   : > { %928 = vsyncadd %s913_s26, %s927_s17  ;;  %p1822_p13 = scmp.ne.s32.totalorder %s1216_s9, 0  ;;  %s1220_s14 = smul.u32 112, %s1594_s22 }
 0x204   : > { %s934_s3 = sshll.u32 %s1775_s25, 4  ;;  %s1178_s15 = sshll.u32 %s1906_s11, 7  ;;  %s1832_s3 = int_to_ptr.vmem [resolvable:$true] %s934_s3 }
 0x205   : > { %s932_s29 = scalar_lea.hbm %s1881_s5, %s1220_s14  ;;  %s1448_s10 = sshra.s32 %s1832_s3, 4  ;;  %s1449_s10 = int_to_ptr.vmem [resolvable:$true] %s1448_s10 }
 0x206   : > { %s936_s7 = sshll.u32 %s932_s29, 4  ;;  %s1450_s16 = sshrl.u32 %s1178_s15, 4  ;;  %s1834_s7 = int_to_ptr.hbm [resolvable:$true] %s936_s7 }
 0x207   : > { %s1455_s28 = scalar_lea.vmem %s1449_s10, %s1450_s16  ;;  %s1540_s22 = smov [#allocation8]  }
 0x208   : > { %p1456_p11 = scmp.ne.s32.totalorder %s1449_s10, %s1455_s28  ;;  %s1459_s25 = scalar_lea.vmem %s1540_s22, 224 }
 0x209   : > { %p1461_p9 = scmp.lt.s32.totalorder %s1459_s25, %s1455_s28 }
 0x20a   : > { %p1457_p2 = pnand %p1456_p11, %p1822_p13 }
 0x20c   : > { %p1458_p5 = pneg %p1457_p2 }
 0x20e   : > { %p1463_p10 = pnand %p1461_p9, %p1458_p5 }
 0x210   : > { %1466 = shalt.err (!%p1463_p10)
}
 0x211   : > { %s1467_s13 = sshra.s32 %s1834_s7, 4  ;;  %s1478_s14 = scalar_lea.hbm %s1881_s5, 200  ;;  %s1468_s13 = int_to_ptr.hbm [resolvable:$true] %s1467_s13 }
 0x212   : > { %s1474_s9 = scalar_lea.hbm %s1468_s13, %s1450_s16  ;;  %p1479_p7 = scmp.lt.s32.totalorder %s1468_s13, %s1881_s5 }
 0x213   : > { %p1475_p1 = scmp.ne.s32.totalorder %s1468_s13, %s1474_s9  ;;  %p1480_p8 = scmp.lt.s32.totalorder %s1478_s14, %s1474_s9 }
 0x215   : > { %p1476_p0 = pnand %p1475_p1, %p1822_p13  ;;  %p1481_p4 = por %p1480_p8, %p1479_p7 }
 0x217   : > { %p1477_p3 = pneg %p1476_p0 }
 0x219   : > { %p1482_p12 = pnand %p1481_p4, %p1477_p3 }
 0x21b   : > { %1485 = shalt.err (!%p1482_p12)
}
 0x21c   : > { %s1541_s29 = smov 128   ;;  %s1542_s10 = smov 8  }
 0x21d   : > { %942 = dma.vmem_to_hbm [thread:$0]  (%p1822_p13), %s1832_s3, %s1178_s15, %s1834_s7, %s913_s26, %s1541_s29, %s1541_s29, %s1542_s10  }
 0x21e PF: > { %s951_s16 = sand.u32 1, %s1517_s18   ;;  %p1897_p6 = scmp.ne.s32.totalorder %s1889_s6, 0 }
 0x21f   : > { %p1898_p11 = scmp.ge.s32.totalorder %s1529_s21, 2  ;;  %s952_s28 = scalar_lea.sflag [#allocation4], %s951_s16 }
 0x221   : > { %p1242_p2 = pnand %p1898_p11, %p1897_p6 }
 0x223   : > { %p1243_p5 = pneg %p1242_p2 }
 0x225   : > { %1512 = dma.done.wait (%p1243_p5), %s952_s28, 1792  }
 0x226   : > { %1514 = vsyncadd (%p1243_p5), %s952_s28, 4294965504  ;;  %p19_p9 = scmp.ge.s32.totalorder %s1598_s24, 4   ;;  %s1899_s18 = smov %s1521_s19 }
 0x227   : > { %s1900_s19 = smov %s1525_s20  ;;  %s1901_s20 = smov %s1610_s27 }
 0x228   : > { %s1902_s21 = smov %s1598_s24  ;;  %21 = sbr.rel (!%p19_p9) target bundleno = 9 (0x9), region = 93 }
 0x22d   :  { %958 = vsyncpa [#allocation3], 1 }
 0x22e   :  { %960 = vsyncpa [#allocation3 + $0x1], 1 }
 0x22f   :  { %961 = vsyncpa [#allocation6], 1 }
 0x230   :  { %962 = vsyncpa [#allocation4], 1 }
 0x231   :  { %964 = vsyncpa [#allocation4 + $0x1], 1 }

</bundles_post_ra>
